<compile_context>
chip_gen: v7x
topology: tpu7x:2x2x1
jax: 0.10.0
libtpu: 0.0.40
codegen_flags: <defaults>
</compile_context>

<pallas_src>
import functools

import jax
import jax.numpy as jnp
from jax.experimental import pallas as pl
from jax.experimental.pallas import tpu as pltpu


def ffn_kernel(x_ref, w1_ref, b1_ref, w2_ref, b2_ref, o_ref, *, compute_dtype):
    # x_ref:  (1, ed, THW)  input tile: channels on sublane, spatial on lane
    # w1_ref: (h, ed)       BN1-folded pw1 weight (compute dtype, resident)
    # b1_ref: (h, 1)        BN1-folded bias (f32)
    # w2_ref: (ed, h)       BN2-folded pw2 weight (compute dtype, resident)
    # b2_ref: (ed, 1)       BN2-folded bias (f32)
    # o_ref:  (1, ed, THW)  output tile (lane-dense: THW is a multiple of 128)
    x = x_ref[0].astype(compute_dtype)                    # no-op if input already bf16
    hid = jnp.dot(w1_ref[...], x, preferred_element_type=jnp.float32)
    hid = jnp.maximum(hid + b1_ref[...], 0.0)             # bias + ReLU in f32
    hid = hid.astype(compute_dtype)
    out = jnp.dot(w2_ref[...], hid, preferred_element_type=jnp.float32)
    o_ref[0] = (out + b2_ref[...]).astype(o_ref.dtype)


def _choose_tile_hw(hw_pad, batch, bytes_per_spatial, vmem_tile_budget, min_programs=8):
    """Largest lane-aligned tile dividing hw_pad that fits the VMEM budget and,
    if possible, still leaves >= min_programs grid steps for pipelining/megacore."""
    candidates = [t for t in range(128, hw_pad + 1, 128) if hw_pad % t == 0]
    candidates.sort(reverse=True)                          # largest first
    fits = [t for t in candidates if t * bytes_per_spatial <= vmem_tile_budget]
    if not fits:
        fits = [candidates[-1]]                            # smallest lane-aligned tile
    for t in fits:
        if batch * (hw_pad // t) >= min_programs:
            return t
    return fits[-1]                                        # maximize step count instead


def ffn_pallas(x_nchw, params, *, out_dtype=None, tile_hw=None,
               compute_dtype=jnp.bfloat16,
               vmem_tile_budget_bytes=12 * 1024 * 1024):
    """x_nchw: (B, ed, H, W), f32 or bf16. params: folded (w1, b1, w2, b2).
    Returns NCHW in `out_dtype` (defaults to the input dtype)."""
    w1, b1, w2, b2 = params
    B, ed, H, W = x_nchw.shape
    h = w1.shape[0]
    HW = H * W
    if out_dtype is None:
        out_dtype = x_nchw.dtype

    # Pad spatial to a multiple of 128 -> unmasked lane-dense loads/stores.
    HW_pad = ((HW + 127) // 128) * 128
    x3 = x_nchw.reshape(B, ed, HW)                         # pure reshape, no transpose
    if HW_pad != HW:
        x3 = jnp.pad(x3, ((0, 0), (0, 0), (0, HW_pad - HW)))

    in_sz = jnp.dtype(x3.dtype).itemsize
    out_sz = jnp.dtype(out_dtype).itemsize
    cp_sz = jnp.dtype(compute_dtype).itemsize

    # Live VMEM bytes per spatial position per grid step (double-buffered I/O,
    # f32 + compute-dtype hidden, optional cast copy of the input tile).
    per_spatial = (2 * ed * in_sz                          # input tile x2 (pipeline)
                   + 2 * ed * out_sz                       # output tile x2 (pipeline)
                   + (ed * cp_sz if jnp.dtype(x3.dtype) != jnp.dtype(compute_dtype) else 0)
                   + h * 4 + h * cp_sz)                    # f32 hid + compute-dtype hid

    if tile_hw is None:
        tile_hw = _choose_tile_hw(HW_pad, B, per_spatial, vmem_tile_budget_bytes)
    else:
        tile_hw = min(tile_hw, HW_pad)
        assert tile_hw % 128 == 0 and HW_pad % tile_hw == 0, \
            "explicit tile_hw must be a lane-aligned divisor of the padded spatial dim"

    w1c = w1.astype(compute_dtype)
    w2c = w2.astype(compute_dtype)
    b1c = b1.reshape(h, 1).astype(jnp.float32)
    b2c = b2.reshape(ed, 1).astype(jnp.float32)

    weight_bytes = (h * ed + ed * h) * cp_sz + (h + ed) * 4
    est_bytes = per_spatial * tile_hw + weight_bytes + (4 << 20)   # + headroom
    vmem_limit = int(min(max(est_bytes, 32 << 20), 48 << 20))

    grid = (B, HW_pad // tile_hw)
    kernel = functools.partial(ffn_kernel, compute_dtype=compute_dtype)

    out3 = pl.pallas_call(
        kernel,
        out_shape=jax.ShapeDtypeStruct((B, ed, HW_pad), out_dtype),
        grid_spec=pltpu.PrefetchScalarGridSpec(
            num_scalar_prefetch=0,
            grid=grid,
            in_specs=[
                pl.BlockSpec((1, ed, tile_hw), lambda b, j: (b, 0, j)),  # x tile
                pl.BlockSpec((h, ed), lambda b, j: (0, 0)),              # w1 (resident)
                pl.BlockSpec((h, 1), lambda b, j: (0, 0)),               # b1 (resident)
                pl.BlockSpec((ed, h), lambda b, j: (0, 0)),              # w2 (resident)
                pl.BlockSpec((ed, 1), lambda b, j: (0, 0)),              # b2 (resident)
            ],
            out_specs=pl.BlockSpec((1, ed, tile_hw), lambda b, j: (b, 0, j)),
        ),
        compiler_params=pltpu.CompilerParams(
            dimension_semantics=("parallel", "parallel"),
            vmem_limit_bytes=vmem_limit),
        cost_estimate=pl.CostEstimate(
            flops=4 * B * ed * h * HW_pad,
            transcendentals=0,
            bytes_accessed=B * ed * HW_pad * (in_sz + out_sz) + weight_bytes),
    )(x3, w1c, b1c, w2c, b2c)

    if HW_pad != HW:
        out3 = out3[:, :, :HW]
    return out3.reshape(B, ed, H, W)


def make_params(key, ed, h, eps=1e-5):
    """Deterministic synthetic FFN(ed, h) parameters with eval-mode BN folded in."""
    ks = jax.random.split(key, 10)
    w1_conv = jax.random.normal(ks[0], (h, ed), jnp.float32) * 0.1   # (out, in)
    w2_conv = jax.random.normal(ks[1], (ed, h), jnp.float32) * 0.1
    g1 = 1.0 + 0.1 * jax.random.normal(ks[2], (h,), jnp.float32)
    be1 = 0.1 * jax.random.normal(ks[3], (h,), jnp.float32)
    mu1 = 0.1 * jax.random.normal(ks[4], (h,), jnp.float32)
    var1 = jnp.abs(jax.random.normal(ks[5], (h,), jnp.float32)) + 0.5
    g2 = 1.0 + 0.1 * jax.random.normal(ks[6], (ed,), jnp.float32)
    be2 = 0.1 * jax.random.normal(ks[7], (ed,), jnp.float32)
    mu2 = 0.1 * jax.random.normal(ks[8], (ed,), jnp.float32)
    var2 = jnp.abs(jax.random.normal(ks[9], (ed,), jnp.float32)) + 0.5

    s1 = g1 / jnp.sqrt(var1 + eps)
    b1 = be1 - mu1 * s1
    s2 = g2 / jnp.sqrt(var2 + eps)
    b2 = be2 - mu2 * s2

    w1f = w1_conv * s1[:, None]   # fold BN1 scale into pw1 output channels
    w2f = w2_conv * s2[:, None]   # fold BN2 scale into pw2 output channels
    return (w1f, b1, w2f, b2)


def ffn_reference(x_nchw, params, out_dtype=None, compute_dtype=jnp.bfloat16):
    """Pure-JAX reference of the FFN forward in matched (bf16-MXU) precision."""
    w1, b1, w2, b2 = params
    B, ed, H, W = x_nchw.shape
    if out_dtype is None:
        out_dtype = x_nchw.dtype
    x = x_nchw.reshape(B, ed, H * W).astype(compute_dtype)
    hid = jnp.einsum("he,bes->bhs", w1.astype(compute_dtype), x,
                     preferred_element_type=jnp.float32)
    hid = jnp.maximum(hid + b1[None, :, None], 0.0).astype(compute_dtype)
    out = jnp.einsum("eh,bhs->bes", w2.astype(compute_dtype), hid,
                     preferred_element_type=jnp.float32)
    out = out + b2[None, :, None]
    return out.reshape(B, ed, H, W).astype(out_dtype)


if __name__ == "__main__":
    key = jax.random.PRNGKey(0)
    kx, kp, kx2 = jax.random.split(key, 3)

    B, ed = 2, 32
    h = 2 * ed                       # typical FFN expansion
    params = make_params(kp, ed, h)

    # Case 1: f32 activations, 128-multiple spatial (16x16). Auto tile -> grid (2, 2).
    H, W = 16, 16
    x = jax.random.normal(kx, (B, ed, H, W), jnp.float32)
    out = jax.block_until_ready(ffn_pallas(x, params))
    ref = ffn_reference(x, params)
    assert out.shape == (B, ed, H, W) and out.dtype == x.dtype
    assert jnp.allclose(out, ref, atol=1e-2, rtol=1e-2), "f32 mismatch vs reference"

    # Case 2: bf16 in / bf16 out, non-128-multiple spatial (14x14 -> padded to 256).
    H2, W2 = 14, 14
    x2 = jax.random.normal(kx2, (B, ed, H2, W2), jnp.float32).astype(jnp.bfloat16)
    out2 = jax.block_until_ready(ffn_pallas(x2, params, out_dtype=jnp.bfloat16))
    ref2 = ffn_reference(x2, params, out_dtype=jnp.bfloat16)
    assert out2.shape == (B, ed, H2, W2) and out2.dtype == jnp.bfloat16
    assert jnp.allclose(out2.astype(jnp.float32), ref2.astype(jnp.float32),
                        atol=5e-2, rtol=5e-2), "bf16/padded mismatch vs reference"

    # Case 3: explicit spatial tile exercises the (batch, spatial) grid + resident weights.
    out3 = jax.block_until_ready(ffn_pallas(x, params, tile_hw=128))
    assert jnp.allclose(out3, ref, atol=1e-2, rtol=1e-2), "tiled mismatch vs reference"

    print("KERNEL_OK")
</pallas_src>

<mosaic_0001>
module attributes {stable_mosaic.version = 11 : i64} {
  func.func @ffn_kernel(%arg0: i32, %arg1: i32, %arg2: memref<1x32x128xf32, #tpu.memory_space<vmem>>, %arg3: memref<64x32xbf16, #tpu.memory_space<vmem>>, %arg4: memref<64x1xf32, #tpu.memory_space<vmem>>, %arg5: memref<32x64xbf16, #tpu.memory_space<vmem>>, %arg6: memref<32x1xf32, #tpu.memory_space<vmem>>, %arg7: memref<1x32x128xf32, #tpu.memory_space<vmem>>) attributes {dimension_semantics = [#tpu.dimension_semantics<parallel>, #tpu.dimension_semantics<parallel>], iteration_bounds = array<i64: 2, 2>, scalar_prefetch = 0 : i64, scratch_operands = 0 : i64, tpu.core_type = #tpu.core_type<tc>, window_params = [{transform_indices = @transform_0, window_bounds = array<i64: 1, 32, 128>}, {pipeline_mode = #tpu.pipeline_mode<synchronous>, transform_indices = @transform_1, window_bounds = array<i64: 64, 32>}, {pipeline_mode = #tpu.pipeline_mode<synchronous>, transform_indices = @transform_2, window_bounds = array<i64: 64, 1>}, {pipeline_mode = #tpu.pipeline_mode<synchronous>, transform_indices = @transform_3, window_bounds = array<i64: 32, 64>}, {pipeline_mode = #tpu.pipeline_mode<synchronous>, transform_indices = @transform_4, window_bounds = array<i64: 32, 1>}, {transform_indices = @transform_5, window_bounds = array<i64: 1, 32, 128>}]} {
    %c0 = arith.constant 0 : index
    %c0_0 = arith.constant 0 : index
    %c0_1 = arith.constant 0 : index
    %0 = vector.load %arg2[%c0, %c0_0, %c0_1] : memref<1x32x128xf32, #tpu.memory_space<vmem>>, vector<1x32x128xf32>
    %1 = vector.shape_cast %0 : vector<1x32x128xf32> to vector<32x128xf32>
    %2 = arith.truncf %1 : vector<32x128xf32> to vector<32x128xbf16>
    %c0_2 = arith.constant 0 : index
    %c0_3 = arith.constant 0 : index
    %3 = vector.load %arg3[%c0_2, %c0_3] : memref<64x32xbf16, #tpu.memory_space<vmem>>, vector<64x32xbf16>
    %cst = arith.constant dense<0.000000e+00> : vector<64x128xf32>
    %4 = tpu.matmul %3, %2, %cst {dimension_numbers = #tpu.dot_dimension_numbers<[1], [0], [0], [1], [0, 0, 1, 1], [], []>} : vector<64x32xbf16>, vector<32x128xbf16>, vector<64x128xf32> -> vector<64x128xf32>
    %c0_4 = arith.constant 0 : index
    %c0_5 = arith.constant 0 : index
    %5 = vector.load %arg4[%c0_4, %c0_5] : memref<64x1xf32, #tpu.memory_space<vmem>>, vector<64x1xf32>
    %6 = vector.broadcast %5 : vector<64x1xf32> to vector<64x128xf32>
    %7 = arith.addf %4, %6 : vector<64x128xf32>
    %cst_6 = arith.constant 0.000000e+00 : f32
    %8 = vector.broadcast %cst_6 : f32 to vector<64x128xf32>
    %9 = arith.maximumf %7, %8 : vector<64x128xf32>
    %10 = arith.truncf %9 : vector<64x128xf32> to vector<64x128xbf16>
    %c0_7 = arith.constant 0 : index
    %c0_8 = arith.constant 0 : index
    %11 = vector.load %arg5[%c0_7, %c0_8] : memref<32x64xbf16, #tpu.memory_space<vmem>>, vector<32x64xbf16>
    %cst_9 = arith.constant dense<0.000000e+00> : vector<32x128xf32>
    %12 = tpu.matmul %11, %10, %cst_9 {dimension_numbers = #tpu.dot_dimension_numbers<[1], [0], [0], [1], [0, 0, 1, 1], [], []>} : vector<32x64xbf16>, vector<64x128xbf16>, vector<32x128xf32> -> vector<32x128xf32>
    %c0_10 = arith.constant 0 : index
    %c0_11 = arith.constant 0 : index
    %13 = vector.load %arg6[%c0_10, %c0_11] : memref<32x1xf32, #tpu.memory_space<vmem>>, vector<32x1xf32>
    %14 = vector.broadcast %13 : vector<32x1xf32> to vector<32x128xf32>
    %15 = arith.addf %12, %14 : vector<32x128xf32>
    %c0_12 = arith.constant 0 : index
    %c0_13 = arith.constant 0 : index
    %c0_14 = arith.constant 0 : index
    %16 = vector.load %arg7[%c0_12, %c0_13, %c0_14] : memref<1x32x128xf32, #tpu.memory_space<vmem>>, vector<1x32x128xf32>
    %17 = vector.shape_cast %16 : vector<1x32x128xf32> to vector<32x128xf32>
    %18 = vector.shape_cast %15 : vector<32x128xf32> to vector<1x32x128xf32>
    tpu.vector_store %arg7[%c0_12, %c0_13, %c0_14], %18 {strides = array<i32>} : memref<1x32x128xf32, #tpu.memory_space<vmem>>, vector<1x32x128xf32>,
    return
  }
  func.func @transform_0(%arg0: i32, %arg1: i32) -> (i32, i32, i32) {
    %c0_i32 = arith.constant 0 : i32
    %c0_i32_0 = arith.constant 0 : i32
    return %arg0, %c0_i32, %arg1 : i32, i32, i32
  }
  func.func @transform_1(%arg0: i32, %arg1: i32) -> (i32, i32) {
    %c0_i32 = arith.constant 0 : i32
    %c0_i32_0 = arith.constant 0 : i32
    %c0_i32_1 = arith.constant 0 : i32
    return %c0_i32, %c0_i32_0 : i32, i32
  }
  func.func @transform_2(%arg0: i32, %arg1: i32) -> (i32, i32) {
    %c0_i32 = arith.constant 0 : i32
    %c0_i32_0 = arith.constant 0 : i32
    %c0_i32_1 = arith.constant 0 : i32
    return %c0_i32, %c0_i32_0 : i32, i32
  }
  func.func @transform_3(%arg0: i32, %arg1: i32) -> (i32, i32) {
    %c0_i32 = arith.constant 0 : i32
    %c0_i32_0 = arith.constant 0 : i32
    %c0_i32_1 = arith.constant 0 : i32
    return %c0_i32, %c0_i32_0 : i32, i32
  }
  func.func @transform_4(%arg0: i32, %arg1: i32) -> (i32, i32) {
    %c0_i32 = arith.constant 0 : i32
    %c0_i32_0 = arith.constant 0 : i32
    %c0_i32_1 = arith.constant 0 : i32
    return %c0_i32, %c0_i32_0 : i32, i32
  }
  func.func @transform_5(%arg0: i32, %arg1: i32) -> (i32, i32, i32) {
    %c0_i32 = arith.constant 0 : i32
    %c0_i32_0 = arith.constant 0 : i32
    return %arg0, %c0_i32, %arg1 : i32, i32, i32
  }
}

</mosaic_0001>

<bundles_post_ra>
// kernel: tpu_custom_call.1
= control target key start
LH: loop header
LB: loop body
LE: loop exit
PB: predicated region body
PF: predicated region fallthrough
CT: control target
= control target key end

     0   :  { %10 = vsyncpa [#allocation4], 0  ;;  %s1148_s0 = inlined_call_operand.vmem [shape: f32[2,32,256], index: 0, kind: input, shape index: {}]   ;;  %s1149_s1 = inlined_call_operand.vmem [shape: bf16[64,32], index: 1, kind: input, shape index: {}]   ;;  %s1150_s2 = inlined_call_operand.vmem [shape: f32[64,1], index: 2, kind: input, shape index: {}]   ;;  %s1151_s3 = inlined_call_operand.vmem [shape: bf16[32,64], index: 3, kind: input, shape index: {}]   ;;  %s1152_s4 = inlined_call_operand.vmem [shape: f32[32,1], index: 4, kind: input, shape index: {}]   ;;  %s1153_s5 = inlined_call_operand.hbm [shape: f32[2,32,256], index: 5, kind: output, shape index: {}]  }
   0x1   :  { %12 = vsyncpa [#allocation4 + $0x1], 0  ;;  %s933_s18 = smov 0   ;;  %s935_s19 = smov 0  }
   0x2   :  { %s937_s20 = smov 0   ;;  %s939_s21 = smov 0  }
   0x3   :  { %s941_s22 = smov 0   ;;  %s943_s23 = smov 0  }
   0x4   :  { %s945_s24 = smov 0   ;;  %s947_s25 = smov 0  }
   0x5 LB: > { %s656_s26 = sadd.s32 4294967295, %s896_s25   ;;  %s657_s27 = sadd.s32 4294967294, %s896_s25   ;;  %s896_s25 = sphi %s947_s25, %s18_s25   ;;  %s892_s24 = sphi %s945_s24, %s1163_s24   ;;  %s888_s23 = sphi %s943_s23, %s1162_s23   ;;  %s884_s22 = sphi %s941_s22, %s1161_s22   ;;  %s880_s21 = sphi %s939_s21, %s1160_s21   ;;  %s876_s20 = sphi %s937_s20, %s1159_s20   ;;  %s872_s19 = sphi %s935_s19, %s1158_s19   ;;  %s868_s18 = sphi %s933_s18, %s1157_s18  }
   0x6   : > { %s27_s28 = sadd.s32 1, %s888_s23  ;;  %s30_s29 = sadd.s32 1, %s892_s24 }
   0x7   : > { %p28_p0 = scmp.ge.s32.totalorder %s27_s28, 2  ;;  %p46_p1 = scmp.ne.s32.totalorder %s876_s20, %s872_s19 }
   0x8   : > { %p47_p2 = scmp.eq.s32.totalorder %s896_s25, 0  ;;  %p162_p5 = scmp.eq.s32.totalorder %s656_s26, 3 }
   0x9   : > { %s1165_s28 = smov (%p28_p0, %s27_s28), 0  ;;  %s1167_s29 = smov (!%p28_p0, %s30_s29), %s892_s24 }
   0xa   : > { %s35_s30 = ssub.s32 %s888_s23, %s1165_s28  ;;  %p985_p3 = por %p47_p2, %p46_p1 }
   0xb   : > { %p32_p4 = scmp.ge.s32.totalorder %s1167_s29, 2  ;;  %p167_p6 = scmp.ne.s32.totalorder %s872_s19, %s868_s18 }
   0xc   : > { %p168_p7 = scmp.eq.s32.totalorder %s657_s27, 3  ;;  %p993_p8 = por %p162_p5, %p46_p1 }
   0xd   : > { %s1169_s29 = smov (%p32_p4, %s1167_s29), 0  ;;  %s39_s11 = sadd.s32 1, %s876_s20 }
   0xe   : > { %p997_p9 = por %p168_p7, %p167_p6  ;;  %s34_s9 = ssub.s32 %s892_s24, %s1169_s29 }
   0xf   : > { %s36_s10 = sor.u32 %s35_s30, %s34_s9  ;;  %p659_p11 = scmp.ge.s32.totalorder %s896_s25, 4 }
  0x10   : > { %p37_p10 = scmp.eq.s32.totalorder %s36_s10, 0 }
  0x11   : > { %196 = sbr.rel (%p659_p11) target bundleno = 32 (0x20), region = 32 }
  0x12   : > { %s1005_s12 = scalar_select %p37_p10, %s876_s20, %s39_s11  }
  0x18   : > { %199 = sbr.rel (!%p985_p3) target bundleno = 32 (0x20), region = 36  ;;  %s201_s13 = sand.u32 (%p985_p3), 1, %s876_s20  }
  0x19   : > { %s661_s14 = sshll.u32 (%p985_p3), %s892_s24, 3  ;;  %s660_s15 = sshll.u32 (%p985_p3), %s201_s13, 5 }
  0x1a   : > { %s205_s16 = sadd.s32 (%p985_p3), %s888_s23, %s661_s14  ;;  %s203_s9 = scalar_lea.vmem (%p985_p3), [#allocation2], %s660_s15 }
  0x1b   : > { %s662_s17 = sshll.u32 (%p985_p3), %s205_s16, 3 }
  0x1c   : > { %s207_s30 = scalar_lea.vmem (%p985_p3), %s1148_s0, %s662_s17 }
  0x1d   : > { %v241_v0 = vld [vmem:[%s207_s30] sm:$0xff] (%p985_p3)  ;;  %v243_v1 = vld [vmem:[%s207_s30 + $0x10] sm:$0xff] (%p985_p3) }
  0x1e   : > { %v245_v2 = vld [vmem:[%s207_s30 + $0x20] sm:$0xff] (%p985_p3)  ;;  %242 = vst [vmem:[%s203_s9] sm:$0xff] (%p985_p3), %v241_v0  ;;  %244 = vst [vmem:[%s203_s9 + $0x8] sm:$0xff] (%p985_p3), %v243_v1  ;;  %v247_v3 = vld [vmem:[%s207_s30 + $0x30] sm:$0xff] (%p985_p3) }
  0x1f   : > { %246 = vst [vmem:[%s203_s9 + $0x10] sm:$0xff] %v245_v2  ;;  %248 = vst [vmem:[%s203_s9 + $0x18] sm:$0xff] %v247_v3 }
  0x20 PF: > { %p663_p12 = scmp.ge.s32.totalorder %s896_s25, 1  ;;  %p253_p13 = scmp.lt.s32.totalorder %s896_s25, 5 }
  0x22   : > { %p254_p0 = pnand %p663_p12, %p253_p13 }
  0x23   : > { %s260_s6 = sand.u32 (!%p254_p0), 1, %s872_s19   ;;  %v796_v4 = vld [vmem:[%s1149_s1] sm:$0xff] (!%p254_p0)   ;;  %vm370_vm0 = vcmask (!%p254_p0), 261120   ;;  %v898_v10 = vmov (!%p254_p0), 0   ;;  %v304_v13 = vld [vmem:[%s1150_s2 + $0x10] sm:$0xff] (!%p254_p0)  ;;  %v303_v14 = vld [vmem:[%s1150_s2 + $0x8] sm:$0xff] (!%p254_p0) }
  0x24   : > { %257 = sbr.rel (%p254_p0) target bundleno = 519 (0x207), region = 74  ;;  %s1024_s13 = sshll.u32 (!%p254_p0), %s260_s6, 5  ;;  %699 = vmatprep.mubr.msk.bf16.mxu0 (!%p254_p0), %vm370_vm0, %v796_v4  ;;  %794 = vset.pattern.permute.xlu0 (!%p254_p0), %v898_v10  ;;  %v302_v12 = vld [vmem:[%s1150_s2] sm:$0xff] (!%p254_p0)  ;;  %v797_v15 = vld [vmem:[%s1149_s1 + $0x8] sm:$0xff] (!%p254_p0)   ;;  %v305_v16 = vld [vmem:[%s1150_s2 + $0x18] sm:$0xff] (!%p254_p0)  ;;  %vm498_vm1 = vcmask (!%p254_p0), 523264  }
  0x25   : > { %s262_s14 = scalar_lea.vmem (!%p254_p0), [#allocation2], %s1024_s13  ;;  %795 = vset.pattern.permute.xlu1 (!%p254_p0), %v898_v10  ;;  %312 = vperm.xlu0 (!%p254_p0), %794, %v302_v12   ;;  %v798_v17 = vld [vmem:[%s1149_s1 + $0x10] sm:$0xff] (!%p254_p0)   ;;  %v306_v18 = vld [vmem:[%s1150_s2 + $0x20] sm:$0xff] (!%p254_p0)  ;;  %v307_v19 = vld [vmem:[%s1150_s2 + $0x28] sm:$0xff] (!%p254_p0)  ;;  %s679_s27 = sshll.u32 (!%p254_p0), %s884_s22, 3 }
  0x26   : > { %v288_v5 = vld [vmem:[%s262_s14] sm:$0xff] (!%p254_p0)  ;;  %v289_v6 = vld [vmem:[%s262_s14 + $0x8] sm:$0xff] (!%p254_p0)  ;;  %v290_v7 = vld [vmem:[%s262_s14 + $0x10] sm:$0xff] (!%p254_p0)  ;;  %322 = vperm.xlu1 (!%p254_p0), %795, %v304_v13   ;;  %s570_s30 = sadd.s32 (!%p254_p0), %s880_s21, %s679_s27  ;;  %s286_s9 = scalar_lea.vmem (!%p254_p0), [#allocation3], %s1024_s13 }
  0x27   : > { %v292_v8 = vpack.c.bf16 (!%p254_p0), %v289_v6, %v288_v5  ;;  %v291_v9 = vld [vmem:[%s262_s14 + $0x18] sm:$0xff] (!%p254_p0)  ;;  %v308_v20 = vld [vmem:[%s1150_s2 + $0x30] sm:$0xff] (!%p254_p0)  ;;  %v464_v23 = vld [vmem:[%s1152_s4] sm:$0xff] (!%p254_p0)  ;;  %s573_s10 = sshll.u32 (!%p254_p0), %s286_s9, 4  ;;  %s680_s11 = sshll.u32 (!%p254_p0), %s570_s30, 7  ;;  %s1087_s10 = int_to_ptr.vmem [resolvable:$true] %s573_s10 }
  0x28   : > { %v293_v11 = vpack.c.bf16 (!%p254_p0), %v291_v9, %v290_v7  ;;  %v309_v21 = vld [vmem:[%s1150_s2 + $0x38] sm:$0xff] (!%p254_p0)  ;;  %v465_v24 = vld [vmem:[%s1152_s4 + $0x8] sm:$0xff] (!%p254_p0)  ;;  %v466_v25 = vld [vmem:[%s1152_s4 + $0x10] sm:$0xff] (!%p254_p0)  ;;  %s1092_s13 = scalar_lea.hbm (!%p254_p0), %s1153_s5, %s680_s11  ;;  %s1096_s14 = scalar_lea.sflag (!%p254_p0), [#allocation4], %s260_s6 }
  0x29   : > { %695 = vmatprep.subr.bf16.mxu0 (!%p254_p0), %v292_v8  ;;  %317 = vperm.xlu0 (!%p254_p0), %794, %v303_v14   ;;  %v799_v22 = vld [vmem:[%s1149_s1 + $0x18] sm:$0xff] (!%p254_p0)   ;;  %v800_v27 = vld [vmem:[%s1151_s3] sm:$0xff] (!%p254_p0)   ;;  %v801_v0 = vld [vmem:[%s1151_s3 + $0x8] sm:$0xff] (!%p254_p0)   ;;  %s802_s15 = scalar_lea.vmem (!%p254_p0), %s1087_s10, 512  ;;  %s899_s16 = smov (!%p254_p0), [#allocation3]  }
  0x2a   : > { %696 = vmatpush3.bf16.msra.mxu0 (!%p254_p0), %v292_v8  ;;  %327 = vperm.xlu1 (!%p254_p0), %795, %v305_v16   ;;  %v467_v26 = vld [vmem:[%s1152_s4 + $0x18] sm:$0xff] (!%p254_p0)  ;;  %p803_p1 = scmp.ne.s32.totalorder (!%p254_p0), %s1087_s10, %s802_s15  ;;  %s806_s17 = sshll.u32 (!%p254_p0), %s899_s16, 4  ;;  %s807_s17 = int_to_ptr.vmem [resolvable:$false] %s806_s17 }
  0x2b   : > { %697 = vmatprep.subr.bf16.mxu0 %v293_v11  ;;  %715 = vmatprep.mubr.msk.bf16.mxu1 %vm498_vm1, %v800_v27  ;;  %s808_s26 = scalar_lea.vmem %s807_s17, 1024  ;;  %p809_p4 = scmp.lt.s32.totalorder %s1087_s10, %s807_s17 }
  0x2c   : > { %p804_p2 = pnand %p803_p1, %p993_p8  ;;  %p810_p5 = scmp.lt.s32.totalorder %s808_s26, %s802_s15 }
  0x2d   : > { %332 = vperm.xlu0 %794, %v306_v18  }
  0x2e   : > { %698 = vmatpush3.bf16.msra.mxu0 %v293_v11  ;;  %337 = vperm.xlu1 %795, %v307_v19   ;;  %p805_p3 = pneg %p804_p2  ;;  %p811_p6 = por %p810_p5, %p809_p4 }
  0x30   : > { %p812_p7 = pnand %p811_p6, %p805_p3 }
  0x31   : > { %700 = vmatmul.mubr.msk.bf16.vlgmr.msra.gmra.mrb[0].mxu0 %vm370_vm0, %v797_v15  ;;  %342 = vperm.xlu0 %794, %v308_v20  }
  0x32   : > { %703 = vmatprep.mubr.msk.bf16.mxu0 %vm370_vm0, %v798_v17  ;;  %347 = vperm.xlu1 %795, %v309_v21  }
  0x35   : > { %470 = vperm.xlu0 %794, %v464_v23  }
  0x36   : > { %475 = vperm.xlu1 %795, %v465_v24  }
  0x39   : > { %704 = vmatmul.mubr.msk.bf16.gmra.mrb[4].mxu0 %vm370_vm0, %v799_v22  ;;  %480 = vperm.xlu0 %794, %v466_v25  }
  0x3a   : > { %485 = vperm.xlu1 %795, %v467_v26  }
  0xa4   : > { %v313_v28 = vpop.permute.xlu0 %312 }
  0xa5   : > { %v323_v29 = vpop.permute.xlu1 %322 }
  0xa8   : > { %v318_v30 = vpop.permute.xlu0 %317 }
  0xa9   : > { %v328_v31 = vpop.permute.xlu1 %327 }
  0xac   : > { %v333_v35 = vpop.permute.xlu0 %332 }
  0xad   : > { %v338_v40 = vpop.permute.xlu1 %337 }
  0xb0   : > { %v343_v47 = vpop.permute.xlu0 %342 }
  0xb1   : > { %v348_v52 = vpop.permute.xlu1 %347 }
  0xb4   : > { %v471_v1 = vpop.permute.xlu0 %470 }
  0xb5   : > { %v476_v2 = vpop.permute.xlu1 %475 }
  0xb8   : > { %v481_v3 = vpop.permute.xlu0 %480 }
  0xb9   : > { %v486_v7 = vpop.permute.xlu1 %485 }
 0x104   : > { %v701_v32 = vpop.f32.mrb[0].mxu0 }
 0x105   : > { %v426_v33 = vadd.f32 %v701_v32, %v323_v29  ;;  %v417_v34 = vpop.f32.mrb[1].mxu0 }
 0x106   : > { %v418_v36 = vadd.f32 %v417_v34, %v313_v28  ;;  %v702_v37 = vpop.f32.mrb[2].mxu0 }
 0x107   : > { %v429_v38 = vadd.f32 %v702_v37, %v328_v31  ;;  %v420_v39 = vpop.f32.mrb[3].mxu0  ;;  %v450_v42 = vmax.f32 %v426_v33, 0.0 }
 0x108   : > { %v421_v41 = vadd.f32 %v420_v39, %v318_v30  ;;  %v448_v44 = vmax.f32 %v418_v36, 0.0 }
 0x109   : > { %v451_v43 = vmax.f32 %v429_v38, 0.0 }
 0x10a   : > { %v449_v45 = vmax.f32 %v421_v41, 0.0 }
 0x10b   : > { %v457_v46 = vpack.c.bf16 %v451_v43, %v450_v42 }
 0x10c   : > { %v705_v48 = vpop.f32.mrb[4].mxu0  ;;  %v456_v49 = vpack.c.bf16 %v449_v45, %v448_v44 }
 0x10d   : > { %v442_v50 = vadd.f32 %v705_v48, %v343_v47  ;;  %v433_v51 = vpop.f32.mrb[5].mxu0 }
 0x10e   : > { %v434_v53 = vadd.f32 %v433_v51, %v333_v35  ;;  %v706_v54 = vpop.f32.mrb[6].mxu0  ;;  %707 = vmatprep.subr.bf16.mxu1 %v456_v49 }
 0x10f   : > { %v445_v55 = vadd.f32 %v706_v54, %v348_v52  ;;  %v436_v56 = vpop.f32.mrb[7].mxu0  ;;  %708 = vmatpush3.bf16.msra.mxu1 %v456_v49  ;;  %v454_v58 = vmax.f32 %v442_v50, 0.0 }
 0x110   : > { %v437_v57 = vadd.f32 %v436_v56, %v338_v40  ;;  %709 = vmatprep.subr.bf16.mxu1 %v457_v46  ;;  %v452_v60 = vmax.f32 %v434_v53, 0.0 }
 0x111   : > { %v455_v59 = vmax.f32 %v445_v55, 0.0 }
 0x112   : > { %v453_v61 = vmax.f32 %v437_v57, 0.0 }
 0x113   : > { %v459_v62 = vpack.c.bf16 %v455_v59, %v454_v58  ;;  %710 = vmatpush3.bf16.msra.mxu1 %v457_v46 }
 0x114   : > { %v458_v63 = vpack.c.bf16 %v453_v61, %v452_v60 }
 0x116   : > { %711 = vmatprep.subr.bf16.mxu1 %v458_v63 }
 0x117   : > { %712 = vmatpush3.bf16.msra.mxu1 %v458_v63 }
 0x118   : > { %713 = vmatprep.subr.bf16.mxu1 %v459_v62 }
 0x11b   : > { %714 = vmatpush3.bf16.msra.mxu1 %v459_v62 }
 0x11e   : > { %716 = vmatmul.mubr.msk.bf16.vlgmr.msra.gmra.mrb[0].mxu1 %vm498_vm1, %v801_v0 }
 0x1f1   : > { %v717_v4 = vpop.f32.mrb[0].mxu1 }
 0x1f2   : > { %v548_v5 = vadd.f32 %v717_v4, %v481_v3  ;;  %v539_v6 = vpop.f32.mrb[1].mxu1 }
 0x1f3   : > { %v540_v8 = vadd.f32 %v539_v6, %v471_v1  ;;  %v718_v9 = vpop.f32.mrb[2].mxu1 }
 0x1f4   : > { %556 = vst [vmem:[%s286_s9 + $0x10] sm:$0xff] %v548_v5  ;;  %v551_v10 = vadd.f32 %v718_v9, %v486_v7  ;;  %v542_v11 = vpop.f32.mrb[3].mxu1 }
 0x1f5   : > { %554 = vst [vmem:[%s286_s9] sm:$0xff] %v540_v8  ;;  %v543_v12 = vadd.f32 %v542_v11, %v476_v2 }
 0x1f6   : > { %557 = vst [vmem:[%s286_s9 + $0x18] sm:$0xff] %v551_v10 }
 0x1f7   : > { %555 = vst [vmem:[%s286_s9 + $0x8] sm:$0xff] %v543_v12 }
 0x1f8   : > { %815 = shalt.err (!%p812_p7)
}
 0x1f9   : > { %s816_s6 = scalar_lea.hbm %s1092_s13, 512  ;;  %s820_s9 = scalar_lea.hbm %s1153_s5, 2048 }
 0x1fa   : > { %p817_p10 = scmp.ne.s32.totalorder %s1092_s13, %s816_s6  ;;  %p821_p13 = scmp.lt.u32.totalorder %s1092_s13, %s1153_s5 }
 0x1fb   : > { %p822_p0 = scmp.lt.u32.totalorder %s820_s9, %s816_s6  ;;  %p824_p2 = scmp.lt.u32.totalorder %s816_s6, %s1092_s13 }
 0x1fc   : > { %p818_p11 = pnand %p817_p10, %p993_p8 }
 0x1fd   : > { %p823_p1 = por %p822_p0, %p821_p13 }
 0x1fe   : > { %p819_p12 = pneg %p818_p11 }
 0x1ff   : > { %p825_p3 = por %p824_p2, %p823_p1 }
 0x201   : > { %p826_p4 = pnand %p825_p3, %p819_p12 }
 0x203   : > { %829 = shalt.err (!%p826_p4)
}
 0x204   : > { %s900_s22 = smov 128   ;;  %s901_s15 = smov 256  }
 0x205   : > { %s902_s16 = smov 8  }
 0x206   : > { %719 = dma.vmem_to_hbm [thread:$0]  (%p993_p8), %s1087_s10, 512, %s1092_s13, %s1096_s14, %s900_s22, %s901_s15, %s902_s16  }
 0x207 PF: > { %p725_p5 = scmp.ge.s32.totalorder %s896_s25, 2  ;;  %s588_s17 = sand.u32 1, %s868_s18  }
 0x208   : > { %s589_s26 = scalar_lea.sflag [#allocation4], %s588_s17 }
 0x209   : > { %p722_p6 = pnand %p725_p5, %p997_p9 }
 0x20b   : > { %863 = dma.done.wait (!%p722_p6), %s589_s26, 512  }
 0x20c   : > { %865 = vsyncadd (!%p722_p6), %s589_s26, 4294966784  ;;  %s18_s25 = sadd.s32 1, %s896_s25   ;;  %s1157_s18 = smov %s872_s19 }
 0x20d   : > { %p15_p7 = scmp.ge.s32.totalorder %s18_s25, 6   ;;  %s1158_s19 = smov %s876_s20 }
 0x20e   : > { %s1159_s20 = smov %s1005_s12  ;;  %s1160_s21 = smov %s888_s23 }
 0x20f   : > { %s1161_s22 = smov %s892_s24  ;;  %s1162_s23 = smov %s1165_s28 }
 0x210   : > { %s1163_s24 = smov %s1169_s29  ;;  %17 = sbr.rel (!%p15_p7) target bundleno = 5 (0x5), region = 118 }
 0x217   :  { %594 = vsyncpa [#allocation4], 1 }
 0x218   :  { %596 = vsyncpa [#allocation4 + $0x1], 1 }

</bundles_post_ra>
